<compile_context>
chip_gen: v6e
topology: v6e:2x2x1
jax: 0.10.0
libtpu: 0.0.40
codegen_flags: <defaults>
</compile_context>

<pallas_src>
import functools

import jax
import jax.numpy as jnp
from jax.experimental import pallas as pl
from jax.experimental.pallas import tpu as pltpu

LANES = 128
MAX_TILE_ROWS = 1024  # (1024, 128) f32 = 512 KiB per input buffer (x2 inputs x2 bufs = 2 MiB)


def _dice_partial_kernel(x_ref, t_ref, out_ref, *, tile_rows, total_rows, needs_mask):
    """Write per-program partial sums, reduced over the sublane (row) axis only.

    out_ref block is (1, 3, LANES):
      sublane 0: sum over rows of sigmoid(x) * t
      sublane 1: sum over rows of sigmoid(x)
      sublane 2: sum over rows of t
    """
    x = x_ref[...].astype(jnp.float32)
    t = t_ref[...].astype(jnp.float32)

    # sigmoid via a single EUP transcendental (tanh) instead of exp + recip.
    s = 0.5 * (jnp.tanh(0.5 * x) + 1.0)

    if needs_mask:
        # Mask rows of the (partial) last tile that lie beyond the real data.
        row0 = pl.program_id(0) * tile_rows
        rid = jax.lax.broadcasted_iota(jnp.int32, (tile_rows, LANES), 0) + row0
        valid = rid < total_rows
        s = jnp.where(valid, s, 0.0)
        t = jnp.where(valid, t, 0.0)

    out_ref[0, 0:1, :] = jnp.sum(s * t, axis=0, keepdims=True)
    out_ref[0, 1:2, :] = jnp.sum(s, axis=0, keepdims=True)
    out_ref[0, 2:3, :] = jnp.sum(t, axis=0, keepdims=True)


@functools.partial(jax.jit, static_argnames=("smooth",))
def dice_loss(inputs, targets, smooth=1e-08):
    """Pallas equivalent of Dice_Loss.forward (sigmoid + global dice)."""
    x = inputs.reshape(-1)
    t = targets.reshape(-1)
    n = x.shape[0]

    rem = n % LANES          # static
    n_main = n - rem
    rows = n_main // LANES

    inter = jnp.float32(0.0)
    s_sum = jnp.float32(0.0)
    t_sum = jnp.float32(0.0)

    if rows > 0:
        # Block second-to-last dim: either the full row extent (always legal for
        # any dtype) or MAX_TILE_ROWS (multiple of 8/16/32, legal for f32/bf16/i8).
        tile_rows = rows if rows <= MAX_TILE_ROWS else MAX_TILE_ROWS
        grid = pl.cdiv(rows, tile_rows)
        needs_mask = (rows % tile_rows) != 0

        x2 = x[:n_main].reshape(rows, LANES)   # native dtype; cast happens in-kernel
        t2 = t[:n_main].reshape(rows, LANES)

        kernel = functools.partial(
            _dice_partial_kernel,
            tile_rows=tile_rows,
            total_rows=rows,
            needs_mask=needs_mask,
        )

        partials = pl.pallas_call(
            kernel,
            out_shape=jax.ShapeDtypeStruct((grid, 3, LANES), jnp.float32),
            grid=(grid,),
            in_specs=[
                pl.BlockSpec((tile_rows, LANES), lambda i: (i, 0)),
                pl.BlockSpec((tile_rows, LANES), lambda i: (i, 0)),
            ],
            out_specs=pl.BlockSpec((1, 3, LANES), lambda i: (i, 0, 0)),
            compiler_params=pltpu.CompilerParams(
                dimension_semantics=("parallel",),
            ),
        )(x2, t2)

        sums = jnp.sum(partials, axis=(0, 2))  # (3,)
        inter = inter + sums[0]
        s_sum = s_sum + sums[1]
        t_sum = t_sum + sums[2]

    if rem:
        # At most 127 leftover elements: negligible, handled in plain JAX.
        x_tail = x[n_main:].astype(jnp.float32)
        t_tail = t[n_main:].astype(jnp.float32)
        s_tail = jax.nn.sigmoid(x_tail)
        inter = inter + jnp.sum(s_tail * t_tail)
        s_sum = s_sum + jnp.sum(s_tail)
        t_sum = t_sum + jnp.sum(t_tail)

    dice = (2.0 * inter + smooth) / (s_sum + t_sum + smooth)
    return 1.0 - dice


def _dice_loss_ref(inputs, targets, smooth=1e-08):
    s = jax.nn.sigmoid(inputs.reshape(-1).astype(jnp.float32))
    t = targets.reshape(-1).astype(jnp.float32)
    inter = jnp.sum(s * t)
    dice = (2.0 * inter + smooth) / (jnp.sum(s) + jnp.sum(t) + smooth)
    return 1.0 - dice


if __name__ == "__main__":
    key = jax.random.PRNGKey(0)
    k1, k2 = jax.random.split(key)
    # Small NCHW-shaped logits and binary targets, as the forward implies.
    x = jax.random.normal(k1, (2, 4, 16, 16), dtype=jnp.float32)
    tgt = (jax.random.uniform(k2, (2, 4, 16, 16)) > 0.5).astype(jnp.float32)

    out = dice_loss(x, tgt)
    jax.block_until_ready(out)

    ref = _dice_loss_ref(x, tgt)
    assert jnp.allclose(out, ref, atol=1e-5, rtol=1e-5), (out, ref)
    print("KERNEL_OK")
</pallas_src>

<mosaic_0001>
module attributes {stable_mosaic.version = 11 : i64} {
  func.func @_dice_partial_kernel(%arg0: i32, %arg1: memref<16x128xf32, #tpu.memory_space<vmem>>, %arg2: memref<16x128xf32, #tpu.memory_space<vmem>>, %arg3: memref<1x3x128xf32, #tpu.memory_space<vmem>>) attributes {dimension_semantics = [#tpu.dimension_semantics<parallel>], iteration_bounds = array<i64: 1>, scalar_prefetch = 0 : i64, scratch_operands = 0 : i64, tpu.core_type = #tpu.core_type<tc>, window_params = [{transform_indices = @transform_0, window_bounds = array<i64: 16, 128>}, {transform_indices = @transform_1, window_bounds = array<i64: 16, 128>}, {transform_indices = @transform_2, window_bounds = array<i64: 1, 3, 128>}]} {
    %c0 = arith.constant 0 : index
    %c0_0 = arith.constant 0 : index
    %0 = vector.load %arg1[%c0, %c0_0] : memref<16x128xf32, #tpu.memory_space<vmem>>, vector<16x128xf32>
    %c0_1 = arith.constant 0 : index
    %c0_2 = arith.constant 0 : index
    %1 = vector.load %arg2[%c0_1, %c0_2] : memref<16x128xf32, #tpu.memory_space<vmem>>, vector<16x128xf32>
    %cst = arith.constant 5.000000e-01 : f32
    %2 = vector.broadcast %cst : f32 to vector<16x128xf32>
    %3 = arith.mulf %2, %0 : vector<16x128xf32>
    %4 = math.tanh %3 : vector<16x128xf32>
    %cst_3 = arith.constant 1.000000e+00 : f32
    %5 = vector.broadcast %cst_3 : f32 to vector<16x128xf32>
    %6 = arith.addf %4, %5 : vector<16x128xf32>
    %cst_4 = arith.constant 5.000000e-01 : f32
    %7 = vector.broadcast %cst_4 : f32 to vector<16x128xf32>
    %8 = arith.mulf %7, %6 : vector<16x128xf32>
    %9 = arith.mulf %8, %1 : vector<16x128xf32>
    %cst_5 = arith.constant dense<0.000000e+00> : vector<128xf32>
    %10 = vector.multi_reduction <add>, %9, %cst_5 [0] : vector<16x128xf32> to vector<128xf32>
    %11 = vector.shape_cast %10 : vector<128xf32> to vector<1x128xf32>
    %c0_6 = arith.constant 0 : index
    %c0_7 = arith.constant 0 : index
    %c0_8 = arith.constant 0 : index
    %12 = vector.load %arg3[%c0_6, %c0_7, %c0_8] : memref<1x3x128xf32, #tpu.memory_space<vmem>>, vector<1x1x128xf32>
    %13 = vector.shape_cast %12 : vector<1x1x128xf32> to vector<1x128xf32>
    %14 = vector.shape_cast %11 : vector<1x128xf32> to vector<1x1x128xf32>
    tpu.vector_store %arg3[%c0_6, %c0_7, %c0_8], %14 {strides = array<i32>} : memref<1x3x128xf32, #tpu.memory_space<vmem>>, vector<1x1x128xf32>,
    %cst_9 = arith.constant dense<0.000000e+00> : vector<128xf32>
    %15 = vector.multi_reduction <add>, %8, %cst_9 [0] : vector<16x128xf32> to vector<128xf32>
    %16 = vector.shape_cast %15 : vector<128xf32> to vector<1x128xf32>
    %c0_10 = arith.constant 0 : index
    %c1 = arith.constant 1 : index
    %c0_11 = arith.constant 0 : index
    %17 = vector.load %arg3[%c0_10, %c1, %c0_11] : memref<1x3x128xf32, #tpu.memory_space<vmem>>, vector<1x1x128xf32>
    %18 = vector.shape_cast %17 : vector<1x1x128xf32> to vector<1x128xf32>
    %19 = vector.shape_cast %16 : vector<1x128xf32> to vector<1x1x128xf32>
    tpu.vector_store %arg3[%c0_10, %c1, %c0_11], %19 {strides = array<i32>} : memref<1x3x128xf32, #tpu.memory_space<vmem>>, vector<1x1x128xf32>,
    %cst_12 = arith.constant dense<0.000000e+00> : vector<128xf32>
    %20 = vector.multi_reduction <add>, %1, %cst_12 [0] : vector<16x128xf32> to vector<128xf32>
    %21 = vector.shape_cast %20 : vector<128xf32> to vector<1x128xf32>
    %c0_13 = arith.constant 0 : index
    %c2 = arith.constant 2 : index
    %c0_14 = arith.constant 0 : index
    %22 = vector.load %arg3[%c0_13, %c2, %c0_14] : memref<1x3x128xf32, #tpu.memory_space<vmem>>, vector<1x1x128xf32>
    %23 = vector.shape_cast %22 : vector<1x1x128xf32> to vector<1x128xf32>
    %24 = vector.shape_cast %21 : vector<1x128xf32> to vector<1x1x128xf32>
    tpu.vector_store %arg3[%c0_13, %c2, %c0_14], %24 {strides = array<i32>} : memref<1x3x128xf32, #tpu.memory_space<vmem>>, vector<1x1x128xf32>,
    return
  }
  func.func @transform_0(%arg0: i32) -> (i32, i32) {
    %c0_i32 = arith.constant 0 : i32
    %c0_i32_0 = arith.constant 0 : i32
    return %arg0, %c0_i32 : i32, i32
  }
  func.func @transform_1(%arg0: i32) -> (i32, i32) {
    %c0_i32 = arith.constant 0 : i32
    %c0_i32_0 = arith.constant 0 : i32
    return %arg0, %c0_i32 : i32, i32
  }
  func.func @transform_2(%arg0: i32) -> (i32, i32, i32) {
    %c0_i32 = arith.constant 0 : i32
    %c0_i32_0 = arith.constant 0 : i32
    %c0_i32_1 = arith.constant 0 : i32
    return %arg0, %c0_i32, %c0_i32_0 : i32, i32, i32
  }
}

</mosaic_0001>

<bundles_post_ra>
// kernel: dice_loss.1
= control target key start
LH: loop header
LB: loop body
LE: loop exit
PB: predicated region body
PF: predicated region fallthrough
CT: control target
= control target key end

     0   :  { %s93_s0 = inlined_call_operand.vmem [shape: f32[16,128], index: 0, kind: input, shape index: {}]   ;;  %s94_s1 = inlined_call_operand.vmem [shape: f32[16,128], index: 1, kind: input, shape index: {}]   ;;  %s95_s2 = inlined_call_operand.vmem [shape: f32[1,3,128], index: 2, kind: output, shape index: {}]  }
   0x1   :  { %v11_v0 = vld [vmem:[%s93_s0] sm:$0xff]  ;;  %v12_v1 = vld [vmem:[%s93_s0 + $0x8] sm:$0xff] }
   0x2   :  { %v13_v2 = vld [vmem:[%s94_s1] sm:$0xff]  ;;  %v14_v3 = vld [vmem:[%s94_s1 + $0x8] sm:$0xff]  ;;  %v15_v4 = vmul.f32 0.5, %v11_v0  ;;  %v16_v5 = vmul.f32 0.5, %v12_v1 }
   0x3   :  { %v41_v6 = vadd.f32 %v14_v3, %v13_v2 }
   0x4   :  { %53 = vtanh.f32 %v15_v4 }
   0x5   :  { %55 = vtanh.f32 %v16_v5  ;;  %v42_v7 = vrot.slane %v41_v6, 4 }
   0x7   :  { %v43_v8 = vadd.f32 %v42_v7, %v41_v6 }
   0x9   :  { %v44_v9 = vrot.slane %v43_v8, 2 }
   0xb   :  { %v45_v10 = vadd.f32 %v44_v9, %v43_v8 }
   0xd   :  { %v46_v11 = vrot.slane %v45_v10, 1 }
   0xf   :  { %v47_v12 = vadd.f32 %v46_v11, %v45_v10 }
  0x11   :  { %v54_v13 = vpop.eup %53  ;;  %48 = vst [vmem:[%s95_s2 + $0x2] sm:$0x1] %v47_v12 }
  0x12   :  { %v56_v14 = vpop.eup %55  ;;  %v19_v15 = vadd.f32 1.0, %v54_v13 }
  0x13   :  { %v20_v16 = vadd.f32 1.0, %v56_v14 }
  0x14   :  { %v21_v17 = vmul.f32 0.5, %v19_v15 }
  0x15   :  { %v22_v18 = vmul.f32 0.5, %v20_v16 }
  0x16   :  { %v23_v19 = vmul.f32 %v21_v17, %v13_v2 }
  0x17   :  { %v24_v20 = vmul.f32 %v22_v18, %v14_v3  ;;  %v33_v21 = vadd.f32 %v22_v18, %v21_v17 }
  0x19   :  { %v25_v22 = vadd.f32 %v24_v20, %v23_v19  ;;  %v34_v23 = vrot.slane %v33_v21, 4 }
  0x1b   :  { %v26_v24 = vrot.slane %v25_v22, 4  ;;  %v35_v25 = vadd.f32 %v34_v23, %v33_v21 }
  0x1d   :  { %v27_v26 = vadd.f32 %v26_v24, %v25_v22  ;;  %v36_v27 = vrot.slane %v35_v25, 2 }
  0x1f   :  { %v28_v28 = vrot.slane %v27_v26, 2  ;;  %v37_v29 = vadd.f32 %v36_v27, %v35_v25 }
  0x21   :  { %v29_v30 = vadd.f32 %v28_v28, %v27_v26  ;;  %v38_v31 = vrot.slane %v37_v29, 1 }
  0x23   :  { %v30_v32 = vrot.slane %v29_v30, 1  ;;  %v39_v33 = vadd.f32 %v38_v31, %v37_v29 }
  0x25   :  { %v31_v34 = vadd.f32 %v30_v32, %v29_v30  ;;  %40 = vst [vmem:[%s95_s2 + $0x1] sm:$0x1] %v39_v33 }
  0x27   :  { %32 = vst [vmem:[%s95_s2] sm:$0x1] %v31_v34 }

</bundles_post_ra>
